<compile_context>
chip_gen: v6e
topology: v6e:2x2x1
jax: 0.10.0
libtpu: 0.0.40
codegen_flags: <defaults>
</compile_context>

<pallas_src>
import functools

import jax
import jax.numpy as jnp
from jax import lax
from jax.experimental import pallas as pl
from jax.experimental.pallas import tpu as pltpu


def _batchnorm_kernel(x_ref, w_ref, b_ref, o_ref, stats_ref, *, eps, inv_m):
    # x_ref: (N, Cblk, HW)    w_ref / b_ref: (Cblk, 1)    stats_ref: (Cblk, 2)
    x = x_ref[...].astype(jnp.float32)

    # Per-channel sum and sum-of-squares from a single pass over the tile.
    # Lane-axis reduce first (XLU), then collapse the small batch axis.
    s = jnp.sum(jnp.sum(x, axis=2, keepdims=True), axis=0)          # (Cblk, 1)
    sq = jnp.sum(jnp.sum(x * x, axis=2, keepdims=True), axis=0)     # (Cblk, 1)

    mean = s * inv_m                                                 # (Cblk, 1)
    # Biased variance (what F.batch_norm uses to normalize in training mode);
    # clamp >= 0 to guard against E[x^2]-mean^2 cancellation.
    var = jnp.maximum(sq * inv_m - mean * mean, 0.0)                 # (Cblk, 1)
    inv_std = lax.rsqrt(var + eps)

    w = w_ref[...].astype(jnp.float32)                               # (Cblk, 1)
    b = b_ref[...].astype(jnp.float32)                               # (Cblk, 1)
    scale = w * inv_std                                              # (Cblk, 1)
    shift = b - mean * scale                                         # (Cblk, 1)

    # One multiply + one add per element; lane-dense store.
    y = x * scale[None, :, :] + shift[None, :, :]
    o_ref[...] = y.astype(o_ref.dtype)

    # Packed per-channel batch statistics: col 0 = mean, col 1 = biased var.
    stats_ref[:, 0:1] = mean
    stats_ref[:, 1:2] = var


def _choose_cblk(N, C, HW, budget_elems=1 << 20):
    """Largest channel-tile that (a) satisfies the (8,128) sublane rule and
    (b) keeps the fp32 working tile under ~4 MiB (budget_elems f32 elements)."""
    if C % 8 != 0:
        # Block equal to the full C dim always satisfies the sublane rule.
        # TODO(synk): pad C to a multiple of 8 (and mask padded channels) so that
        # huge inputs with awkward C can still be channel-tiled.
        return C
    per_c = N * HW
    best = 8
    c = 8
    while c <= C:
        if C % c == 0 and c * per_c <= budget_elems:
            best = c
        c += 8
    # TODO(synk): if even Cblk=8 exceeds the budget (enormous N*H*W), fall back
    # to a two-pass (Ctiles, Mtiles) grid with sum/sumsq accumulation scratch.
    return best


def batch_norm_forward(x_nchw, weight, bias, running_mean, running_var,
                       num_batches_tracked, *, eps=1e-5, momentum=0.1,
                       training=True, track_running_stats=True):
    """Forward of _BatchNorm (sketch branch). Returns (out, new_running_mean,
    new_running_var, new_num_batches_tracked)."""
    N, C, H, W = x_nchw.shape
    HW = H * W
    M = N * HW
    x = x_nchw.reshape(N, C, HW)          # free reshape, no data movement

    cblk = _choose_cblk(N, C, HW)
    grid = (C // cblk,)

    itemsize = jnp.dtype(x_nchw.dtype).itemsize
    tile_in_bytes = N * cblk * HW * itemsize
    tile_f32_bytes = N * cblk * HW * 4
    # double-buffered in + out tiles, fp32 temporaries, plus slack; clamp to the
    # v7x physical ceiling (64 MiB) and the v6e/v7x scoped default (32 MiB) floor.
    vmem_limit = int(min(64 * 1024 * 1024,
                         max(32 * 1024 * 1024,
                             4 * tile_in_bytes + 3 * tile_f32_bytes + (1 << 20))))

    kernel = functools.partial(_batchnorm_kernel, eps=eps, inv_m=1.0 / M)

    out, stats = pl.pallas_call(
        kernel,
        grid=grid,
        in_specs=[
            pl.BlockSpec((N, cblk, HW), lambda c: (0, c, 0)),
            pl.BlockSpec((cblk, 1), lambda c: (c, 0)),
            pl.BlockSpec((cblk, 1), lambda c: (c, 0)),
        ],
        out_specs=(
            pl.BlockSpec((N, cblk, HW), lambda c: (0, c, 0)),
            pl.BlockSpec((cblk, 2), lambda c: (c, 0)),
        ),
        out_shape=(
            jax.ShapeDtypeStruct((N, C, HW), x_nchw.dtype),
            jax.ShapeDtypeStruct((C, 2), jnp.float32),
        ),
        compiler_params=pltpu.CompilerParams(
            dimension_semantics=("parallel",),
            vmem_limit_bytes=vmem_limit),
    )(x, weight.reshape(C, 1), bias.reshape(C, 1))

    out = out.reshape(N, C, H, W)         # free reshape back to NCHW
    batch_mean = stats[:, 0]
    batch_var = stats[:, 1]               # biased

    if training and track_running_stats:
        new_nbt = num_batches_tracked + 1
        # PyTorch: momentum=None -> cumulative moving average factor 1/nbt.
        exp_avg = momentum if momentum is not None else 1.0 / float(new_nbt)
        # running_var is updated with the UNBIASED batch variance.
        unbiased_var = batch_var * (M / max(M - 1, 1))
        new_running_mean = (1.0 - exp_avg) * running_mean + exp_avg * batch_mean
        new_running_var = (1.0 - exp_avg) * running_var + exp_avg * unbiased_var
    else:
        new_running_mean, new_running_var, new_nbt = (
            running_mean, running_var, num_batches_tracked)
    # TODO(synk): eval-mode path (training=False, track_running_stats=True) would
    # normalize with running stats instead of batch stats; not exercised here.
    return out, new_running_mean, new_running_var, new_nbt


if __name__ == "__main__":
    key = jax.random.PRNGKey(0)
    N, C, H, W = 2, 4, 16, 16
    x = jax.random.normal(key, (N, C, H, W), dtype=jnp.float32)

    # Parameters / buffers, deterministic init matching reset_parameters():
    weight = jnp.ones((C,), jnp.float32)            # init.ones_
    bias = jnp.zeros((C,), jnp.float32)             # init.zeros_
    running_mean_sketch = jnp.zeros((C,), jnp.float32)
    running_var_sketch = jnp.ones((C,), jnp.float32)
    num_batches_tracked_sketch = 0

    out, rm, rv, nbt = batch_norm_forward(
        x, weight, bias, running_mean_sketch, running_var_sketch,
        num_batches_tracked_sketch, eps=1e-5, momentum=0.1,
        training=True, track_running_stats=True)
    jax.block_until_ready(out)
    jax.block_until_ready(rm)
    jax.block_until_ready(rv)

    # Sanity check vs. pure-JAX reference.
    mean_ref = jnp.mean(x, axis=(0, 2, 3), keepdims=True)
    var_ref = jnp.mean((x - mean_ref) ** 2, axis=(0, 2, 3), keepdims=True)
    ref = ((x - mean_ref) / jnp.sqrt(var_ref + 1e-5)
           * weight.reshape(1, C, 1, 1) + bias.reshape(1, C, 1, 1))
    assert jnp.max(jnp.abs(out - ref)) < 1e-4, "output mismatch vs reference"

    Mtot = N * H * W
    rm_ref = 0.9 * running_mean_sketch + 0.1 * mean_ref.reshape(C)
    rv_ref = 0.9 * running_var_sketch + 0.1 * var_ref.reshape(C) * (Mtot / (Mtot - 1))
    assert jnp.max(jnp.abs(rm - rm_ref)) < 1e-5, "running_mean mismatch"
    assert jnp.max(jnp.abs(rv - rv_ref)) < 1e-5, "running_var mismatch"
    assert nbt == 1

    print("KERNEL_OK")
</pallas_src>

<mosaic_0001>
module attributes {stable_mosaic.version = 11 : i64} {
  func.func @_batchnorm_kernel(%arg0: i32, %arg1: memref<2x4x256xf32, #tpu.memory_space<vmem>>, %arg2: memref<4x1xf32, #tpu.memory_space<vmem>>, %arg3: memref<4x1xf32, #tpu.memory_space<vmem>>, %arg4: memref<2x4x256xf32, #tpu.memory_space<vmem>>, %arg5: memref<4x2xf32, #tpu.memory_space<vmem>>) attributes {dimension_semantics = [#tpu.dimension_semantics<parallel>], iteration_bounds = array<i64: 1>, scalar_prefetch = 0 : i64, scratch_operands = 0 : i64, tpu.core_type = #tpu.core_type<tc>, window_params = [{transform_indices = @transform_0, window_bounds = array<i64: 2, 4, 256>}, {transform_indices = @transform_1, window_bounds = array<i64: 4, 1>}, {transform_indices = @transform_2, window_bounds = array<i64: 4, 1>}, {transform_indices = @transform_3, window_bounds = array<i64: 2, 4, 256>}, {transform_indices = @transform_4, window_bounds = array<i64: 4, 2>}]} {
    %c0 = arith.constant 0 : index
    %c0_0 = arith.constant 0 : index
    %c0_1 = arith.constant 0 : index
    %0 = vector.load %arg1[%c0, %c0_0, %c0_1] : memref<2x4x256xf32, #tpu.memory_space<vmem>>, vector<2x4x256xf32>
    %cst = arith.constant dense<0.000000e+00> : vector<2x4xf32>
    %1 = vector.multi_reduction <add>, %0, %cst [2] : vector<2x4x256xf32> to vector<2x4xf32>
    %2 = vector.shape_cast %1 : vector<2x4xf32> to vector<2x4x1xf32>
    %cst_2 = arith.constant dense<0.000000e+00> : vector<4x1xf32>
    %3 = vector.multi_reduction <add>, %2, %cst_2 [0] : vector<2x4x1xf32> to vector<4x1xf32>
    %4 = arith.mulf %0, %0 : vector<2x4x256xf32>
    %cst_3 = arith.constant dense<0.000000e+00> : vector<2x4xf32>
    %5 = vector.multi_reduction <add>, %4, %cst_3 [2] : vector<2x4x256xf32> to vector<2x4xf32>
    %6 = vector.shape_cast %5 : vector<2x4xf32> to vector<2x4x1xf32>
    %cst_4 = arith.constant dense<0.000000e+00> : vector<4x1xf32>
    %7 = vector.multi_reduction <add>, %6, %cst_4 [0] : vector<2x4x1xf32> to vector<4x1xf32>
    %cst_5 = arith.constant 0.001953125 : f32
    %8 = vector.broadcast %cst_5 : f32 to vector<4x1xf32>
    %9 = arith.mulf %3, %8 : vector<4x1xf32>
    %cst_6 = arith.constant 0.001953125 : f32
    %10 = vector.broadcast %cst_6 : f32 to vector<4x1xf32>
    %11 = arith.mulf %7, %10 : vector<4x1xf32>
    %12 = arith.mulf %9, %9 : vector<4x1xf32>
    %13 = arith.subf %11, %12 : vector<4x1xf32>
    %cst_7 = arith.constant 0.000000e+00 : f32
    %14 = vector.broadcast %cst_7 : f32 to vector<4x1xf32>
    %15 = arith.maximumf %13, %14 : vector<4x1xf32>
    %cst_8 = arith.constant 9.99999974E-6 : f32
    %16 = vector.broadcast %cst_8 : f32 to vector<4x1xf32>
    %17 = arith.addf %15, %16 : vector<4x1xf32>
    %18 = math.rsqrt %17 : vector<4x1xf32>
    %c0_9 = arith.constant 0 : index
    %c0_10 = arith.constant 0 : index
    %19 = vector.load %arg2[%c0_9, %c0_10] : memref<4x1xf32, #tpu.memory_space<vmem>>, vector<4x1xf32>
    %c0_11 = arith.constant 0 : index
    %c0_12 = arith.constant 0 : index
    %20 = vector.load %arg3[%c0_11, %c0_12] : memref<4x1xf32, #tpu.memory_space<vmem>>, vector<4x1xf32>
    %21 = arith.mulf %19, %18 : vector<4x1xf32>
    %22 = arith.mulf %9, %21 : vector<4x1xf32>
    %23 = arith.subf %20, %22 : vector<4x1xf32>
    %24 = vector.shape_cast %21 : vector<4x1xf32> to vector<1x4x1xf32>
    %25 = vector.broadcast %24 : vector<1x4x1xf32> to vector<2x4x256xf32>
    %26 = arith.mulf %0, %25 : vector<2x4x256xf32>
    %27 = vector.shape_cast %23 : vector<4x1xf32> to vector<1x4x1xf32>
    %28 = vector.broadcast %27 : vector<1x4x1xf32> to vector<2x4x256xf32>
    %29 = arith.addf %26, %28 : vector<2x4x256xf32>
    %c0_13 = arith.constant 0 : index
    %c0_14 = arith.constant 0 : index
    %c0_15 = arith.constant 0 : index
    %30 = vector.load %arg4[%c0_13, %c0_14, %c0_15] : memref<2x4x256xf32, #tpu.memory_space<vmem>>, vector<2x4x256xf32>
    tpu.vector_store %arg4[%c0_13, %c0_14, %c0_15], %29 {strides = array<i32>} : memref<2x4x256xf32, #tpu.memory_space<vmem>>, vector<2x4x256xf32>,
    %c0_16 = arith.constant 0 : index
    %c0_17 = arith.constant 0 : index
    %31 = vector.load %arg5[%c0_16, %c0_17] : memref<4x2xf32, #tpu.memory_space<vmem>>, vector<4x1xf32>
    tpu.vector_store %arg5[%c0_16, %c0_17], %9 {strides = array<i32>} : memref<4x2xf32, #tpu.memory_space<vmem>>, vector<4x1xf32>,
    %c0_18 = arith.constant 0 : index
    %c1 = arith.constant 1 : index
    %32 = vector.load %arg5[%c0_18, %c1] : memref<4x2xf32, #tpu.memory_space<vmem>>, vector<4x1xf32>
    tpu.vector_store %arg5[%c0_18, %c1], %15 {strides = array<i32>} : memref<4x2xf32, #tpu.memory_space<vmem>>, vector<4x1xf32>,
    return
  }
  func.func @transform_0(%arg0: i32) -> (i32, i32, i32) {
    %c0_i32 = arith.constant 0 : i32
    %c0_i32_0 = arith.constant 0 : i32
    %c0_i32_1 = arith.constant 0 : i32
    return %c0_i32, %arg0, %c0_i32_0 : i32, i32, i32
  }
  func.func @transform_1(%arg0: i32) -> (i32, i32) {
    %c0_i32 = arith.constant 0 : i32
    %c0_i32_0 = arith.constant 0 : i32
    return %arg0, %c0_i32 : i32, i32
  }
  func.func @transform_2(%arg0: i32) -> (i32, i32) {
    %c0_i32 = arith.constant 0 : i32
    %c0_i32_0 = arith.constant 0 : i32
    return %arg0, %c0_i32 : i32, i32
  }
  func.func @transform_3(%arg0: i32) -> (i32, i32, i32) {
    %c0_i32 = arith.constant 0 : i32
    %c0_i32_0 = arith.constant 0 : i32
    %c0_i32_1 = arith.constant 0 : i32
    return %c0_i32, %arg0, %c0_i32_0 : i32, i32, i32
  }
  func.func @transform_4(%arg0: i32) -> (i32, i32) {
    %c0_i32 = arith.constant 0 : i32
    %c0_i32_0 = arith.constant 0 : i32
    return %arg0, %c0_i32 : i32, i32
  }
}

</mosaic_0001>

<bundles_post_ra>
// kernel: tpu_custom_call.1
= control target key start
LH: loop header
LB: loop body
LE: loop exit
PB: predicated region body
PF: predicated region fallthrough
CT: control target
= control target key end

     0   :  { %10 = vsyncpa [#allocation3], 0  ;;  %s280_s0 = inlined_call_operand.hbm [shape: f32[2,4,256], index: 0, kind: input, shape index: {}]   ;;  %s281_s1 = inlined_call_operand.vmem [shape: f32[4,1], index: 1, kind: input, shape index: {}]   ;;  %s282_s2 = inlined_call_operand.vmem [shape: f32[4,1], index: 2, kind: input, shape index: {}]   ;;  %s283_s3 = inlined_call_operand.hbm [shape: f32[2,4,256], index: 3, kind: output, shape index: {0}]   ;;  %s284_s4 = inlined_call_operand.vmem [shape: f32[4,2], index: 4, kind: output, shape index: {1}]  }
   0x1   :  { %11 = vsyncpa [#allocation4], 0  ;;  %s197_s15 = smov [#allocation2]  }
   0x2   :  { %s17_s16 = sshll.u32 %s197_s15, 4  ;;  %s18_s16 = int_to_ptr.vmem [resolvable:$true] %s17_s16 }
   0x3   :  { %s161_s17 = scalar_lea.vmem %s18_s16, 256  ;;  %p166_p1 = scmp.lt.s32.totalorder %s18_s16, %s18_s16 }
   0x4   :  { %p162_p0 = scmp.ne.s32.totalorder %s18_s16, %s161_s17  ;;  %p167_p2 = scmp.lt.s32.totalorder %s161_s17, %s161_s17 }
   0x6   :  { %p168_p3 = por %p167_p2, %p166_p1 }
   0x8   :  { %p169_p4 = pnand %p168_p3, %p162_p0 }
   0xa   :  { %172 = shalt.err (!%p169_p4)
}
   0xb   :  { %s198_s18 = smov 128   ;;  %s199_s19 = smov 8  }
   0xc   :  { %23 = dma.hbm_to_vmem [thread:$0]  %s280_s0, 256, %s18_s16, [#allocation3], %s198_s18, %s198_s18, %s199_s19  }
   0xd   :  { %193 = dma.done.wait [#allocation3], 256  }
   0xe   :  { %194 = vsyncadd [#allocation3], 4294967040  ;;  %vm39_vm0 = vcmask 1043456   ;;  %v234_v0 = vld [vmem:[#allocation2] sm:$0xff]  ;;  %v236_v1 = vld [vmem:[#allocation2 + $0x8] sm:$0xff]  ;;  %v200_v20 = vmov 0   ;;  %v93_v45 = vlaneseq }
   0xf   :  { %v35_v2 = vcombine.high %v234_v0, %v234_v0  ;;  %v40_v3 = vsel %vm39_vm0, %v234_v0, 0.0  ;;  %v53_v4 = vmul.f32 %v234_v0, %v234_v0  ;;  %v36_v5 = vcombine.high %v236_v1, %v236_v1  ;;  %147 = vset.pattern.permute.xlu0 %v200_v20  ;;  %148 = vset.pattern.permute.xlu1 %v200_v20  ;;  %v81_v37 = vld [vmem:[%s281_s1] sm:$0xf]  ;;  %s202_s1 = smov [#allocation5]  }
  0x10   :  { %v45_v6 = vsel %vm39_vm0, %v236_v1, 0.0  ;;  %v54_v7 = vmul.f32 %v236_v1, %v236_v1  ;;  %vm116_vm1 = vcmask 3072   ;;  %vm118_vm2 = vcmask 11272   ;;  %v82_v40 = vld [vmem:[%s282_s2] sm:$0xf] }
  0x11   :  { %v41_v8 = vsel %vm39_vm0, %v35_v2, 0.0  ;;  %v57_v9 = vcombine.high %v53_v4, %v53_v4  ;;  %v61_v10 = vsel %vm39_vm0, %v53_v4, 0.0  ;;  %v46_v11 = vsel %vm39_vm0, %v36_v5, 0.0 }
  0x12   :  { %v42_v12 = vadd.f32 %v41_v8, %v40_v3  ;;  %v58_v13 = vcombine.high %v54_v7, %v54_v7  ;;  %v66_v15 = vsel %vm39_vm0, %v54_v7, 0.0  ;;  %v47_v17 = vadd.f32 %v46_v11, %v45_v6 }
  0x13   :  { %v62_v14 = vsel %vm39_vm0, %v57_v9, 0.0  ;;  %v201_v43 = vmov 839922192   ;;  %v94_v47 = vshrl.u32 %v93_v45, 7 }
  0x14   :  { %43 = vadd.xlane.f32.xlu0 %v42_v12  ;;  %v63_v16 = vadd.f32 %v62_v14, %v61_v10  ;;  %v67_v18 = vsel %vm39_vm0, %v58_v13, 0.0  ;;  %v91_v44 = vunpack.c.l.s4 %v201_v43 }
  0x15   :  { %v68_v19 = vadd.f32 %v67_v18, %v66_v15 }
  0x16   :  { %64 = vadd.xlane.f32.xlu1 %v63_v16  ;;  %v92_v46 = vunpack.c.0.s8 %v91_v44 }
  0x18   :  { %48 = vadd.xlane.f32.xlu0 %v47_v17  ;;  %v95_v48 = vsub.s32 %v92_v46, %v94_v47 }
  0x1a   :  { %69 = vadd.xlane.f32.xlu1 %v68_v19 }
  0x9d   :  { %v44_v21 = vpop.xlane.xlu0 %43 }
  0x9e   :  { %v50_v24 = vsel %vm39_vm0, %v44_v21, 0.0 }
  0x9f   :  { %v65_v22 = vpop.xlane.xlu1 %64 }
  0xa0   :  { %v71_v28 = vsel %vm39_vm0, %v65_v22, 0.0 }
  0xa1   :  { %v49_v23 = vpop.xlane.xlu0 %48 }
  0xa2   :  { %v51_v25 = vsel %vm39_vm0, %v49_v23, 0.0 }
  0xa3   :  { %v52_v26 = vadd.f32 %v51_v25, %v50_v24  ;;  %v70_v27 = vpop.xlane.xlu1 %69 }
  0xa4   :  { %v72_v29 = vsel %vm39_vm0, %v70_v27, 0.0 }
  0xa5   :  { %v74_v30 = vmul.f32 0.001953125, %v52_v26  ;;  %v73_v31 = vadd.f32 %v72_v29, %v71_v28 }
  0xa7   :  { %117 = vst.msk [vmem:[%s284_s4] sm:$0xf] %vm116_vm1, %v74_v30  ;;  %v75_v32 = vmul.f32 0.001953125, %v73_v31  ;;  %v76_v33 = vmul.f32 %v74_v30, %v74_v30 }
  0xa9   :  { %v77_v34 = vsub.f32 %v75_v32, %v76_v33 }
  0xab   :  { %v78_v35 = vmax.f32 %v77_v34, 0.0 }
  0xad   :  { %v79_v36 = vadd.f32 1e-05, %v78_v35  ;;  %119 = vst.msk [vmem:[%s284_s4] sm:$0xf] %vm118_vm2, %v78_v35  ;;  %s125_s4 = sshll.u32 %s202_s1, 4  ;;  %s126_s4 = int_to_ptr.vmem [resolvable:$true] %s125_s4 }
  0xae   :  { %s173_s2 = scalar_lea.vmem %s126_s4, 256  ;;  %p178_p6 = scmp.lt.s32.totalorder %s126_s4, %s126_s4 }
  0xaf   :  { %151 = vrsqrt.f32 %v79_v36  ;;  %p174_p5 = scmp.ne.s32.totalorder %s126_s4, %s173_s2  ;;  %p179_p7 = scmp.lt.s32.totalorder %s173_s2, %s173_s2 }
  0xb1   :  { %p180_p8 = por %p179_p7, %p178_p6 }
  0xb3   :  { %p181_p9 = pnand %p180_p8, %p174_p5 }
  0xbc   :  { %v152_v38 = vpop.eup %151 }
  0xbd   :  { %v83_v39 = vmul.f32 %v152_v38, %v81_v37 }
  0xbf   :  { %88 = vperm.xlu0 %147, %v83_v39   ;;  %v84_v41 = vmul.f32 %v83_v39, %v74_v30 }
  0xc1   :  { %v85_v42 = vsub.f32 %v82_v40, %v84_v41 }
  0xc3   :  { %102 = vperm.xlu1 %148, %v85_v42  }
 0x13a   :  { %v89_v49 = vpop.permute.xlu0 %88 }
 0x13b   :  { %v96_v50 = vrot.slane %v89_v49, %v95_v48 }
 0x13d   :  { %v98_v52 = vmul.f32 %v96_v50, %v234_v0  ;;  %v99_v53 = vmul.f32 %v96_v50, %v236_v1 }
 0x13e   :  { %v103_v51 = vpop.permute.xlu1 %102 }
 0x13f   :  { %v110_v54 = vrot.slane %v103_v51, %v95_v48 }
 0x141   :  { %v112_v55 = vadd.f32 %v110_v54, %v98_v52  ;;  %v113_v56 = vadd.f32 %v110_v54, %v99_v53 }
 0x143   :  { %114 = vst [vmem:[#allocation5] sm:$0xff] %v112_v55  ;;  %115 = vst [vmem:[#allocation5 + $0x8] sm:$0xff] %v113_v56 }
 0x144   :  { %184 = shalt.err (!%p181_p9)
}
 0x145   :  { %131 = dma.vmem_to_hbm [thread:$0]  %s126_s4, 256, %s283_s3, [#allocation4], %s198_s18, %s198_s18, %s199_s19  }
 0x146   :  { %195 = dma.done.wait [#allocation4], 256  }
 0x147   :  { %196 = vsyncadd [#allocation4], 4294967040 }
 0x148   :  { %139 = vsyncpa [#allocation3], 1 }
 0x149   :  { %140 = vsyncpa [#allocation4], 1 }

</bundles_post_ra>
